<compile_context>
chip_gen: v6e
topology: v6e:2x2x1
jax: 0.10.0
libtpu: 0.0.40
codegen_flags: <defaults>
</compile_context>

<pallas_src>
import functools

import jax
import jax.numpy as jnp
from jax import lax
from jax.experimental import pallas as pl
from jax.experimental.pallas import tpu as pltpu


# Row indices inside the stacked (3, N) persistent-state array.
_ROW_EMA_LOSS = 0
_ROW_EMA_LR = 1
_ROW_VAR_NR = 2


def _cov_balancer_kernel(
    losses_ref,        # VMEM (K, N) f32 in : loss vector for each of K steps
    state_ref,         # VMEM (3, N) f32 in : [ema_loss, ema_loss_ratio, var_nr]
    step_ref,          # SMEM (1,)   i32 in
    ema_dr_ref,        # SMEM (1,)   f32 in
    out_ref,           # VMEM (K, 1) f32 out: sum(w * loss) per step
    new_state_ref,     # VMEM (3, N) f32 out (aliased with state_ref)
    new_step_ref,      # SMEM (1,)   i32 out (aliased)
    new_ema_dr_ref,    # SMEM (1,)   f32 out (aliased)
    *,
    decay,
    eps,
    num_steps,
):
    # Single full-tile load of the persistent state; rows sliced from the value.
    state0 = state_ref[...]
    carry0 = (
        step_ref[0],                                   # step   (i32 scalar)
        ema_dr_ref[0],                                 # ema_dr (f32 scalar)
        state0[_ROW_EMA_LOSS:_ROW_EMA_LOSS + 1, :],    # (1, N)
        state0[_ROW_EMA_LR:_ROW_EMA_LR + 1, :],        # (1, N)
        state0[_ROW_VAR_NR:_ROW_VAR_NR + 1, :],        # (1, N)
    )

    def body(k, carry):
        step, ema_dr, ema_loss, ema_lr, var_nr = carry
        loss = losses_ref[pl.ds(k, 1), :]              # (1, N)

        # ---- update() ----
        step = step + 1
        step_f = step.astype(jnp.float32)
        inv_step = 1.0 / step_f
        if decay is None:
            d = inv_step
        else:
            d = jnp.float32(decay)
        one_minus_d = 1.0 - d

        ema_dr = one_minus_d * ema_dr + d              # scalar
        inv_ema_dr = 1.0 / ema_dr                      # one scalar reciprocal, reused

        ema_loss = (one_minus_d * ema_loss + d * loss) * inv_ema_dr
        loss_ratio = (loss + eps) / (ema_loss + eps)
        new_ema_lr = (one_minus_d * ema_lr + d * loss_ratio) * inv_ema_dr
        var_nr = var_nr + (loss_ratio - ema_lr) * (loss_ratio - new_ema_lr)
        ema_lr = new_ema_lr

        # ---- compute() + forward(), normalization folded:
        #      sum(w * loss) = sum(cov * loss) / sum(cov) ----
        std_lr = jnp.sqrt(var_nr * inv_step + eps)
        cov = std_lr / ema_lr
        # Merge the two cross-lane reductions into one (2, N) -> (2, 1) reduce.
        sums = jnp.sum(jnp.concatenate([cov * loss, cov], axis=0),
                       axis=1, keepdims=True)          # (2, 1)
        total = sums[0:1, :] * pl.reciprocal(sums[1:2, :])   # exact reciprocal
        out_ref[pl.ds(k, 1), :] = total

        return (step, ema_dr, ema_loss, ema_lr, var_nr)

    step, ema_dr, ema_loss, ema_lr, var_nr = lax.fori_loop(
        0, num_steps, body, carry0, unroll=num_steps <= 8)

    # Single full-tile store of the updated persistent state.
    new_state_ref[...] = jnp.concatenate([ema_loss, ema_lr, var_nr], axis=0)
    new_step_ref[0] = step
    new_ema_dr_ref[0] = ema_dr


def init_cov_balancer_state(num_losses: int):
    """Mirrors the registered buffers in CoVBalancer.__init__ (all zeros)."""
    return dict(
        vec=jnp.zeros((3, num_losses), jnp.float32),   # [ema_loss, ema_loss_ratio, var_nr]
        step=jnp.zeros((1,), jnp.int32),
        ema_dr=jnp.zeros((1,), jnp.float32),
    )


@functools.partial(jax.jit, static_argnames=("decay", "eps"),
                   donate_argnames=("state",))
def cov_balancer_forward_batched(losses, state, *, decay=None, eps=1e-6):
    """Run K sequential CoVBalancer.forward() steps in ONE pallas_call.

    losses: (K, N) stacked loss vectors (step-major).  The recurrence is
    strictly serial, so the K steps run in-order on one core with the EMA
    state held in registers; only the launch + HBM round trip is amortized.
    Returns (weighted_losses (K,), new_state).
    """
    k_steps, n = losses.shape

    kernel = functools.partial(_cov_balancer_kernel, decay=decay,
                               eps=float(eps), num_steps=k_steps)

    vmem = pl.BlockSpec(memory_space=pltpu.MemorySpace.VMEM)
    smem = pl.BlockSpec(memory_space=pltpu.MemorySpace.SMEM)

    out, new_vec, new_step, new_ema_dr = pl.pallas_call(
        kernel,
        out_shape=(
            jax.ShapeDtypeStruct((k_steps, 1), jnp.float32),  # per-step sum(w*loss)
            jax.ShapeDtypeStruct((3, n), jnp.float32),        # state rows
            jax.ShapeDtypeStruct((1,), jnp.int32),            # step
            jax.ShapeDtypeStruct((1,), jnp.float32),          # ema_dr
        ),
        in_specs=[vmem, vmem, smem, smem],
        out_specs=(vmem, vmem, smem, smem),
        # Update the persistent state buffers in place (no fresh HBM allocs).
        input_output_aliases={1: 1, 2: 2, 3: 3},
    )(losses.astype(jnp.float32), state["vec"], state["step"], state["ema_dr"])

    new_state = dict(vec=new_vec, step=new_step, ema_dr=new_ema_dr)
    return out[:, 0], new_state


def cov_balancer_forward(loss, state, *, decay=None, eps=1e-6):
    """One forward() call (K=1).  Prefer the batched entry point in production."""
    out, new_state = cov_balancer_forward_batched(loss[None, :], state,
                                                  decay=decay, eps=eps)
    return out[0], new_state


def cov_balancer_forward_from_dict(loss_dict, state, *, decay=None, eps=1e-6):
    """Fidelity helper mirroring forward(loss_dict): stacks the dict values."""
    loss = jnp.stack(list(loss_dict.values()))
    return cov_balancer_forward(loss, state, decay=decay, eps=eps)


# ---------------------------------------------------------------------------
# Pure-JAX reference (direct transcription of the PyTorch module) for checking.
# ---------------------------------------------------------------------------
def _ref_forward(loss, state, decay=None, eps=1e-6):
    step = state["step"] + 1
    step_f = step.astype(jnp.float32)
    d = (1.0 / step_f) if decay is None else jnp.float32(decay)
    ema_dr = (1.0 - d) * state["ema_dr"] + d * 1.0
    ema_loss = ((1.0 - d) * state["ema_loss"] + d * loss) / ema_dr
    loss_ratio = (loss + eps) / (ema_loss + eps)
    ema_lr = ((1.0 - d) * state["ema_loss_ratio"] + d * loss_ratio) / ema_dr
    var_nr = state["var_nr"] + (loss_ratio - state["ema_loss_ratio"]) * (loss_ratio - ema_lr)
    std_lr = jnp.sqrt(var_nr / step_f + eps)
    cov_lr = std_lr / ema_lr
    w = cov_lr / jnp.sum(cov_lr)
    new_state = dict(step=step, ema_dr=ema_dr, ema_loss=ema_loss,
                     ema_loss_ratio=ema_lr, var_nr=var_nr)
    return jnp.sum(w * loss), new_state


if __name__ == "__main__":
    NUM_LOSSES = 8
    NUM_STEPS = 6
    EPS = 1e-6

    key = jax.random.PRNGKey(0)
    base = jnp.abs(jax.random.normal(key, (NUM_LOSSES,), jnp.float32)) + 0.5
    # Geometrically decaying loss sequence.  NOTE: with a fixed decay the
    # module's var_nr increment can legitimately go negative while ema_dr < 1
    # (sqrt of a negative -> NaN in the original PyTorch too); a monotonically
    # decaying sequence keeps every increment positive, so both decay settings
    # stay finite and the numeric check is meaningful.
    losses = base[None, :] * (0.5 ** jnp.arange(NUM_STEPS, dtype=jnp.float32))[:, None]

    for decay in (None, 0.7):
        # --- pure-JAX sequential reference ---
        r_state = dict(
            step=jnp.zeros((), jnp.int32),
            ema_dr=jnp.zeros((), jnp.float32),
            ema_loss=jnp.zeros((NUM_LOSSES,), jnp.float32),
            ema_loss_ratio=jnp.zeros((NUM_LOSSES,), jnp.float32),
            var_nr=jnp.zeros((NUM_LOSSES,), jnp.float32),
        )
        ref_outs = []
        for t in range(NUM_STEPS):
            ref_o, r_state = _ref_forward(losses[t], r_state, decay=decay, eps=EPS)
            ref_outs.append(ref_o)
        ref_outs = jnp.stack(ref_outs)
        assert bool(jnp.all(jnp.isfinite(ref_outs))), f"reference NaN (decay={decay})"

        # --- batched kernel: all NUM_STEPS steps in one pallas_call ---
        k_state = init_cov_balancer_state(NUM_LOSSES)
        outs, k_state = cov_balancer_forward_batched(losses, k_state,
                                                     decay=decay, eps=EPS)
        outs = jax.block_until_ready(outs)

        assert bool(jnp.all(jnp.isfinite(outs))), f"kernel NaN (decay={decay})"
        assert jnp.allclose(outs, ref_outs, rtol=1e-5, atol=1e-5), (
            f"decay={decay}: kernel={outs} ref={ref_outs}")
        assert jnp.allclose(k_state["vec"][_ROW_EMA_LOSS], r_state["ema_loss"],
                            rtol=1e-5, atol=1e-5)
        assert jnp.allclose(k_state["vec"][_ROW_EMA_LR], r_state["ema_loss_ratio"],
                            rtol=1e-5, atol=1e-5)
        assert jnp.allclose(k_state["vec"][_ROW_VAR_NR], r_state["var_nr"],
                            rtol=1e-5, atol=1e-5)
        assert int(k_state["step"][0]) == int(r_state["step"])
        assert jnp.allclose(k_state["ema_dr"][0], r_state["ema_dr"],
                            rtol=1e-5, atol=1e-5)

        # --- single-step (K=1 per call) wrapper path, same kernel ---
        s_state = init_cov_balancer_state(NUM_LOSSES)
        for t in range(NUM_STEPS):
            s_out, s_state = cov_balancer_forward(losses[t], s_state,
                                                  decay=decay, eps=EPS)
        s_out = jax.block_until_ready(s_out)
        assert jnp.allclose(s_out, ref_outs[-1], rtol=1e-5, atol=1e-5)
        assert jnp.allclose(s_state["vec"], k_state["vec"], rtol=1e-5, atol=1e-5)

    print("KERNEL_OK")
</pallas_src>

<mosaic_0001>
module attributes {stable_mosaic.version = 11 : i64} {
  func.func @_cov_balancer_kernel(%arg0: memref<6x8xf32, #tpu.memory_space<vmem>>, %arg1: memref<3x8xf32, #tpu.memory_space<vmem>>, %arg2: memref<1xi32, #tpu.memory_space<smem>>, %arg3: memref<1xf32, #tpu.memory_space<smem>>, %arg4: memref<6x1xf32, #tpu.memory_space<vmem>>, %arg5: memref<3x8xf32, #tpu.memory_space<vmem>>, %arg6: memref<1xi32, #tpu.memory_space<smem>>, %arg7: memref<1xf32, #tpu.memory_space<smem>>) attributes {dimension_semantics = [], scalar_prefetch = 0 : i64, scratch_operands = 0 : i64, tpu.core_type = #tpu.core_type<tc>} {
    %c0 = arith.constant 0 : index
    %c0_0 = arith.constant 0 : index
    %0 = vector.load %arg1[%c0, %c0_0] : memref<3x8xf32, #tpu.memory_space<vmem>>, vector<3x8xf32>
    %c0_1 = arith.constant 0 : index
    %1 = memref.load %arg2[%c0_1] : memref<1xi32, #tpu.memory_space<smem>>
    %c0_2 = arith.constant 0 : index
    %2 = memref.load %arg3[%c0_2] : memref<1xf32, #tpu.memory_space<smem>>
    %3 = vector.extract_strided_slice %0 {offsets = [0, 0], sizes = [1, 8], strides = [1, 1]} : vector<3x8xf32> to vector<1x8xf32>
    %4 = vector.extract_strided_slice %0 {offsets = [1, 0], sizes = [1, 8], strides = [1, 1]} : vector<3x8xf32> to vector<1x8xf32>
    %5 = vector.extract_strided_slice %0 {offsets = [2, 0], sizes = [1, 8], strides = [1, 1]} : vector<3x8xf32> to vector<1x8xf32>
    %c0_i32 = arith.constant 0 : i32
    %6 = arith.index_cast %c0_i32 : i32 to index
    %c0_3 = arith.constant 0 : index
    %7 = vector.load %arg0[%6, %c0_3] : memref<6x8xf32, #tpu.memory_space<vmem>>, vector<1x8xf32>
    %c1_i32 = arith.constant 1 : i32
    %8 = arith.addi %1, %c1_i32 : i32
    %9 = arith.sitofp %8 : i32 to f32
    %cst = arith.constant 1.000000e+00 : f32
    %10 = arith.divf %cst, %9 : f32
    %cst_4 = arith.constant 1.000000e+00 : f32
    %11 = arith.subf %cst_4, %10 : f32
    %12 = arith.mulf %11, %2 : f32
    %13 = arith.addf %12, %10 : f32
    %cst_5 = arith.constant 1.000000e+00 : f32
    %14 = arith.divf %cst_5, %13 : f32
    %15 = vector.broadcast %11 : f32 to vector<1x8xf32>
    %16 = arith.mulf %15, %3 : vector<1x8xf32>
    %17 = vector.broadcast %10 : f32 to vector<1x8xf32>
    %18 = arith.mulf %17, %7 : vector<1x8xf32>
    %19 = arith.addf %16, %18 : vector<1x8xf32>
    %20 = vector.broadcast %14 : f32 to vector<1x8xf32>
    %21 = arith.mulf %19, %20 : vector<1x8xf32>
    %cst_6 = arith.constant 9.99999997E-7 : f32
    %22 = vector.broadcast %cst_6 : f32 to vector<1x8xf32>
    %23 = arith.addf %7, %22 : vector<1x8xf32>
    %cst_7 = arith.constant 9.99999997E-7 : f32
    %24 = vector.broadcast %cst_7 : f32 to vector<1x8xf32>
    %25 = arith.addf %21, %24 : vector<1x8xf32>
    %26 = arith.divf %23, %25 : vector<1x8xf32>
    %27 = vector.broadcast %11 : f32 to vector<1x8xf32>
    %28 = arith.mulf %27, %4 : vector<1x8xf32>
    %29 = vector.broadcast %10 : f32 to vector<1x8xf32>
    %30 = arith.mulf %29, %26 : vector<1x8xf32>
    %31 = arith.addf %28, %30 : vector<1x8xf32>
    %32 = vector.broadcast %14 : f32 to vector<1x8xf32>
    %33 = arith.mulf %31, %32 : vector<1x8xf32>
    %34 = arith.subf %26, %4 : vector<1x8xf32>
    %35 = arith.subf %26, %33 : vector<1x8xf32>
    %36 = arith.mulf %34, %35 : vector<1x8xf32>
    %37 = arith.addf %5, %36 : vector<1x8xf32>
    %38 = vector.broadcast %10 : f32 to vector<1x8xf32>
    %39 = arith.mulf %37, %38 : vector<1x8xf32>
    %cst_8 = arith.constant 9.99999997E-7 : f32
    %40 = vector.broadcast %cst_8 : f32 to vector<1x8xf32>
    %41 = arith.addf %39, %40 : vector<1x8xf32>
    %42 = math.sqrt %41 : vector<1x8xf32>
    %43 = arith.divf %42, %33 : vector<1x8xf32>
    %44 = arith.mulf %43, %7 : vector<1x8xf32>
    %45 = tpu.concatenate %44, %43 in 0 : vector<1x8xf32>, vector<1x8xf32> -> vector<2x8xf32>
    %cst_9 = arith.constant dense<0.000000e+00> : vector<2xf32>
    %46 = vector.multi_reduction <add>, %45, %cst_9 [1] : vector<2x8xf32> to vector<2xf32>
    %47 = vector.shape_cast %46 : vector<2xf32> to vector<2x1xf32>
    %48 = vector.extract_strided_slice %47 {offsets = [0, 0], sizes = [1, 1], strides = [1, 1]} : vector<2x1xf32> to vector<1x1xf32>
    %49 = vector.extract_strided_slice %47 {offsets = [1, 0], sizes = [1, 1], strides = [1, 1]} : vector<2x1xf32> to vector<1x1xf32>
    %50 = tpu.reciprocal %49 : vector<1x1xf32> -> vector<1x1xf32>
    %51 = arith.mulf %48, %50 : vector<1x1xf32>
    %52 = arith.index_cast %c0_i32 : i32 to index
    %c0_10 = arith.constant 0 : index
    %53 = vector.load %arg4[%52, %c0_10] : memref<6x1xf32, #tpu.memory_space<vmem>>, vector<1x1xf32>
    tpu.vector_store %arg4[%52, %c0_10], %51 {strides = array<i32>} : memref<6x1xf32, #tpu.memory_space<vmem>>, vector<1x1xf32>,
    %c1_i32_11 = arith.constant 1 : i32
    %54 = arith.index_cast %c1_i32_11 : i32 to index
    %c0_12 = arith.constant 0 : index
    %55 = vector.load %arg0[%54, %c0_12] : memref<6x8xf32, #tpu.memory_space<vmem>>, vector<1x8xf32>
    %c1_i32_13 = arith.constant 1 : i32
    %56 = arith.addi %8, %c1_i32_13 : i32
    %57 = arith.sitofp %56 : i32 to f32
    %cst_14 = arith.constant 1.000000e+00 : f32
    %58 = arith.divf %cst_14, %57 : f32
    %cst_15 = arith.constant 1.000000e+00 : f32
    %59 = arith.subf %cst_15, %58 : f32
    %60 = arith.mulf %59, %13 : f32
    %61 = arith.addf %60, %58 : f32
    %cst_16 = arith.constant 1.000000e+00 : f32
    %62 = arith.divf %cst_16, %61 : f32
    %63 = vector.broadcast %59 : f32 to vector<1x8xf32>
    %64 = arith.mulf %63, %21 : vector<1x8xf32>
    %65 = vector.broadcast %58 : f32 to vector<1x8xf32>
    %66 = arith.mulf %65, %55 : vector<1x8xf32>
    %67 = arith.addf %64, %66 : vector<1x8xf32>
    %68 = vector.broadcast %62 : f32 to vector<1x8xf32>
    %69 = arith.mulf %67, %68 : vector<1x8xf32>
    %cst_17 = arith.constant 9.99999997E-7 : f32
    %70 = vector.broadcast %cst_17 : f32 to vector<1x8xf32>
    %71 = arith.addf %55, %70 : vector<1x8xf32>
    %cst_18 = arith.constant 9.99999997E-7 : f32
    %72 = vector.broadcast %cst_18 : f32 to vector<1x8xf32>
    %73 = arith.addf %69, %72 : vector<1x8xf32>
    %74 = arith.divf %71, %73 : vector<1x8xf32>
    %75 = vector.broadcast %59 : f32 to vector<1x8xf32>
    %76 = arith.mulf %75, %33 : vector<1x8xf32>
    %77 = vector.broadcast %58 : f32 to vector<1x8xf32>
    %78 = arith.mulf %77, %74 : vector<1x8xf32>
    %79 = arith.addf %76, %78 : vector<1x8xf32>
    %80 = vector.broadcast %62 : f32 to vector<1x8xf32>
    %81 = arith.mulf %79, %80 : vector<1x8xf32>
    %82 = arith.subf %74, %33 : vector<1x8xf32>
    %83 = arith.subf %74, %81 : vector<1x8xf32>
    %84 = arith.mulf %82, %83 : vector<1x8xf32>
    %85 = arith.addf %37, %84 : vector<1x8xf32>
    %86 = vector.broadcast %58 : f32 to vector<1x8xf32>
    %87 = arith.mulf %85, %86 : vector<1x8xf32>
    %cst_19 = arith.constant 9.99999997E-7 : f32
    %88 = vector.broadcast %cst_19 : f32 to vector<1x8xf32>
    %89 = arith.addf %87, %88 : vector<1x8xf32>
    %90 = math.sqrt %89 : vector<1x8xf32>
    %91 = arith.divf %90, %81 : vector<1x8xf32>
    %92 = arith.mulf %91, %55 : vector<1x8xf32>
    %93 = tpu.concatenate %92, %91 in 0 : vector<1x8xf32>, vector<1x8xf32> -> vector<2x8xf32>
    %cst_20 = arith.constant dense<0.000000e+00> : vector<2xf32>
    %94 = vector.multi_reduction <add>, %93, %cst_20 [1] : vector<2x8xf32> to vector<2xf32>
    %95 = vector.shape_cast %94 : vector<2xf32> to vector<2x1xf32>
    %96 = vector.extract_strided_slice %95 {offsets = [0, 0], sizes = [1, 1], strides = [1, 1]} : vector<2x1xf32> to vector<1x1xf32>
    %97 = vector.extract_strided_slice %95 {offsets = [1, 0], sizes = [1, 1], strides = [1, 1]} : vector<2x1xf32> to vector<1x1xf32>
    %98 = tpu.reciprocal %97 : vector<1x1xf32> -> vector<1x1xf32>
    %99 = arith.mulf %96, %98 : vector<1x1xf32>
    %100 = arith.index_cast %c1_i32_11 : i32 to index
    %c0_21 = arith.constant 0 : index
    %101 = vector.load %arg4[%100, %c0_21] : memref<6x1xf32, #tpu.memory_space<vmem>>, vector<1x1xf32>
    tpu.vector_store %arg4[%100, %c0_21], %99 {strides = array<i32>} : memref<6x1xf32, #tpu.memory_space<vmem>>, vector<1x1xf32>,
    %c2_i32 = arith.constant 2 : i32
    %102 = arith.index_cast %c2_i32 : i32 to index
    %c0_22 = arith.constant 0 : index
    %103 = vector.load %arg0[%102, %c0_22] : memref<6x8xf32, #tpu.memory_space<vmem>>, vector<1x8xf32>
    %c1_i32_23 = arith.constant 1 : i32
    %104 = arith.addi %56, %c1_i32_23 : i32
    %105 = arith.sitofp %104 : i32 to f32
    %cst_24 = arith.constant 1.000000e+00 : f32
    %106 = arith.divf %cst_24, %105 : f32
    %cst_25 = arith.constant 1.000000e+00 : f32
    %107 = arith.subf %cst_25, %106 : f32
    %108 = arith.mulf %107, %61 : f32
    %109 = arith.addf %108, %106 : f32
    %cst_26 = arith.constant 1.000000e+00 : f32
    %110 = arith.divf %cst_26, %109 : f32
    %111 = vector.broadcast %107 : f32 to vector<1x8xf32>
    %112 = arith.mulf %111, %69 : vector<1x8xf32>
    %113 = vector.broadcast %106 : f32 to vector<1x8xf32>
    %114 = arith.mulf %113, %103 : vector<1x8xf32>
    %115 = arith.addf %112, %114 : vector<1x8xf32>
    %116 = vector.broadcast %110 : f32 to vector<1x8xf32>
    %117 = arith.mulf %115, %116 : vector<1x8xf32>
    %cst_27 = arith.constant 9.99999997E-7 : f32
    %118 = vector.broadcast %cst_27 : f32 to vector<1x8xf32>
    %119 = arith.addf %103, %118 : vector<1x8xf32>
    %cst_28 = arith.constant 9.99999997E-7 : f32
    %120 = vector.broadcast %cst_28 : f32 to vector<1x8xf32>
    %121 = arith.addf %117, %120 : vector<1x8xf32>
    %122 = arith.divf %119, %121 : vector<1x8xf32>
    %123 = vector.broadcast %107 : f32 to vector<1x8xf32>
    %124 = arith.mulf %123, %81 : vector<1x8xf32>
    %125 = vector.broadcast %106 : f32 to vector<1x8xf32>
    %126 = arith.mulf %125, %122 : vector<1x8xf32>
    %127 = arith.addf %124, %126 : vector<1x8xf32>
    %128 = vector.broadcast %110 : f32 to vector<1x8xf32>
    %129 = arith.mulf %127, %128 : vector<1x8xf32>
    %130 = arith.subf %122, %81 : vector<1x8xf32>
    %131 = arith.subf %122, %129 : vector<1x8xf32>
    %132 = arith.mulf %130, %131 : vector<1x8xf32>
    %133 = arith.addf %85, %132 : vector<1x8xf32>
    %134 = vector.broadcast %106 : f32 to vector<1x8xf32>
    %135 = arith.mulf %133, %134 : vector<1x8xf32>
    %cst_29 = arith.constant 9.99999997E-7 : f32
    %136 = vector.broadcast %cst_29 : f32 to vector<1x8xf32>
    %137 = arith.addf %135, %136 : vector<1x8xf32>
    %138 = math.sqrt %137 : vector<1x8xf32>
    %139 = arith.divf %138, %129 : vector<1x8xf32>
    %140 = arith.mulf %139, %103 : vector<1x8xf32>
    %141 = tpu.concatenate %140, %139 in 0 : vector<1x8xf32>, vector<1x8xf32> -> vector<2x8xf32>
    %cst_30 = arith.constant dense<0.000000e+00> : vector<2xf32>
    %142 = vector.multi_reduction <add>, %141, %cst_30 [1] : vector<2x8xf32> to vector<2xf32>
    %143 = vector.shape_cast %142 : vector<2xf32> to vector<2x1xf32>
    %144 = vector.extract_strided_slice %143 {offsets = [0, 0], sizes = [1, 1], strides = [1, 1]} : vector<2x1xf32> to vector<1x1xf32>
    %145 = vector.extract_strided_slice %143 {offsets = [1, 0], sizes = [1, 1], strides = [1, 1]} : vector<2x1xf32> to vector<1x1xf32>
    %146 = tpu.reciprocal %145 : vector<1x1xf32> -> vector<1x1xf32>
    %147 = arith.mulf %144, %146 : vector<1x1xf32>
    %148 = arith.index_cast %c2_i32 : i32 to index
    %c0_31 = arith.constant 0 : index
    %149 = vector.load %arg4[%148, %c0_31] : memref<6x1xf32, #tpu.memory_space<vmem>>, vector<1x1xf32>
    tpu.vector_store %arg4[%148, %c0_31], %147 {strides = array<i32>} : memref<6x1xf32, #tpu.memory_space<vmem>>, vector<1x1xf32>,
    %c3_i32 = arith.constant 3 : i32
    %150 = arith.index_cast %c3_i32 : i32 to index
    %c0_32 = arith.constant 0 : index
    %151 = vector.load %arg0[%150, %c0_32] : memref<6x8xf32, #tpu.memory_space<vmem>>, vector<1x8xf32>
    %c1_i32_33 = arith.constant 1 : i32
    %152 = arith.addi %104, %c1_i32_33 : i32
    %153 = arith.sitofp %152 : i32 to f32
    %cst_34 = arith.constant 1.000000e+00 : f32
    %154 = arith.divf %cst_34, %153 : f32
    %cst_35 = arith.constant 1.000000e+00 : f32
    %155 = arith.subf %cst_35, %154 : f32
    %156 = arith.mulf %155, %109 : f32
    %157 = arith.addf %156, %154 : f32
    %cst_36 = arith.constant 1.000000e+00 : f32
    %158 = arith.divf %cst_36, %157 : f32
    %159 = vector.broadcast %155 : f32 to vector<1x8xf32>
    %160 = arith.mulf %159, %117 : vector<1x8xf32>
    %161 = vector.broadcast %154 : f32 to vector<1x8xf32>
    %162 = arith.mulf %161, %151 : vector<1x8xf32>
    %163 = arith.addf %160, %162 : vector<1x8xf32>
    %164 = vector.broadcast %158 : f32 to vector<1x8xf32>
    %165 = arith.mulf %163, %164 : vector<1x8xf32>
    %cst_37 = arith.constant 9.99999997E-7 : f32
    %166 = vector.broadcast %cst_37 : f32 to vector<1x8xf32>
    %167 = arith.addf %151, %166 : vector<1x8xf32>
    %cst_38 = arith.constant 9.99999997E-7 : f32
    %168 = vector.broadcast %cst_38 : f32 to vector<1x8xf32>
    %169 = arith.addf %165, %168 : vector<1x8xf32>
    %170 = arith.divf %167, %169 : vector<1x8xf32>
    %171 = vector.broadcast %155 : f32 to vector<1x8xf32>
    %172 = arith.mulf %171, %129 : vector<1x8xf32>
    %173 = vector.broadcast %154 : f32 to vector<1x8xf32>
    %174 = arith.mulf %173, %170 : vector<1x8xf32>
    %175 = arith.addf %172, %174 : vector<1x8xf32>
    %176 = vector.broadcast %158 : f32 to vector<1x8xf32>
    %177 = arith.mulf %175, %176 : vector<1x8xf32>
    %178 = arith.subf %170, %129 : vector<1x8xf32>
    %179 = arith.subf %170, %177 : vector<1x8xf32>
    %180 = arith.mulf %178, %179 : vector<1x8xf32>
    %181 = arith.addf %133, %180 : vector<1x8xf32>
    %182 = vector.broadcast %154 : f32 to vector<1x8xf32>
    %183 = arith.mulf %181, %182 : vector<1x8xf32>
    %cst_39 = arith.constant 9.99999997E-7 : f32
    %184 = vector.broadcast %cst_39 : f32 to vector<1x8xf32>
    %185 = arith.addf %183, %184 : vector<1x8xf32>
    %186 = math.sqrt %185 : vector<1x8xf32>
    %187 = arith.divf %186, %177 : vector<1x8xf32>
    %188 = arith.mulf %187, %151 : vector<1x8xf32>
    %189 = tpu.concatenate %188, %187 in 0 : vector<1x8xf32>, vector<1x8xf32> -> vector<2x8xf32>
    %cst_40 = arith.constant dense<0.000000e+00> : vector<2xf32>
    %190 = vector.multi_reduction <add>, %189, %cst_40 [1] : vector<2x8xf32> to vector<2xf32>
    %191 = vector.shape_cast %190 : vector<2xf32> to vector<2x1xf32>
    %192 = vector.extract_strided_slice %191 {offsets = [0, 0], sizes = [1, 1], strides = [1, 1]} : vector<2x1xf32> to vector<1x1xf32>
    %193 = vector.extract_strided_slice %191 {offsets = [1, 0], sizes = [1, 1], strides = [1, 1]} : vector<2x1xf32> to vector<1x1xf32>
    %194 = tpu.reciprocal %193 : vector<1x1xf32> -> vector<1x1xf32>
    %195 = arith.mulf %192, %194 : vector<1x1xf32>
    %196 = arith.index_cast %c3_i32 : i32 to index
    %c0_41 = arith.constant 0 : index
    %197 = vector.load %arg4[%196, %c0_41] : memref<6x1xf32, #tpu.memory_space<vmem>>, vector<1x1xf32>
    tpu.vector_store %arg4[%196, %c0_41], %195 {strides = array<i32>} : memref<6x1xf32, #tpu.memory_space<vmem>>, vector<1x1xf32>,
    %c4_i32 = arith.constant 4 : i32
    %198 = arith.index_cast %c4_i32 : i32 to index
    %c0_42 = arith.constant 0 : index
    %199 = vector.load %arg0[%198, %c0_42] : memref<6x8xf32, #tpu.memory_space<vmem>>, vector<1x8xf32>
    %c1_i32_43 = arith.constant 1 : i32
    %200 = arith.addi %152, %c1_i32_43 : i32
    %201 = arith.sitofp %200 : i32 to f32
    %cst_44 = arith.constant 1.000000e+00 : f32
    %202 = arith.divf %cst_44, %201 : f32
    %cst_45 = arith.constant 1.000000e+00 : f32
    %203 = arith.subf %cst_45, %202 : f32
    %204 = arith.mulf %203, %157 : f32
    %205 = arith.addf %204, %202 : f32
    %cst_46 = arith.constant 1.000000e+00 : f32
    %206 = arith.divf %cst_46, %205 : f32
    %207 = vector.broadcast %203 : f32 to vector<1x8xf32>
    %208 = arith.mulf %207, %165 : vector<1x8xf32>
    %209 = vector.broadcast %202 : f32 to vector<1x8xf32>
    %210 = arith.mulf %209, %199 : vector<1x8xf32>
    %211 = arith.addf %208, %210 : vector<1x8xf32>
    %212 = vector.broadcast %206 : f32 to vector<1x8xf32>
    %213 = arith.mulf %211, %212 : vector<1x8xf32>
    %cst_47 = arith.constant 9.99999997E-7 : f32
    %214 = vector.broadcast %cst_47 : f32 to vector<1x8xf32>
    %215 = arith.addf %199, %214 : vector<1x8xf32>
    %cst_48 = arith.constant 9.99999997E-7 : f32
    %216 = vector.broadcast %cst_48 : f32 to vector<1x8xf32>
    %217 = arith.addf %213, %216 : vector<1x8xf32>
    %218 = arith.divf %215, %217 : vector<1x8xf32>
    %219 = vector.broadcast %203 : f32 to vector<1x8xf32>
    %220 = arith.mulf %219, %177 : vector<1x8xf32>
    %221 = vector.broadcast %202 : f32 to vector<1x8xf32>
    %222 = arith.mulf %221, %218 : vector<1x8xf32>
    %223 = arith.addf %220, %222 : vector<1x8xf32>
    %224 = vector.broadcast %206 : f32 to vector<1x8xf32>
    %225 = arith.mulf %223, %224 : vector<1x8xf32>
    %226 = arith.subf %218, %177 : vector<1x8xf32>
    %227 = arith.subf %218, %225 : vector<1x8xf32>
    %228 = arith.mulf %226, %227 : vector<1x8xf32>
    %229 = arith.addf %181, %228 : vector<1x8xf32>
    %230 = vector.broadcast %202 : f32 to vector<1x8xf32>
    %231 = arith.mulf %229, %230 : vector<1x8xf32>
    %cst_49 = arith.constant 9.99999997E-7 : f32
    %232 = vector.broadcast %cst_49 : f32 to vector<1x8xf32>
    %233 = arith.addf %231, %232 : vector<1x8xf32>
    %234 = math.sqrt %233 : vector<1x8xf32>
    %235 = arith.divf %234, %225 : vector<1x8xf32>
    %236 = arith.mulf %235, %199 : vector<1x8xf32>
    %237 = tpu.concatenate %236, %235 in 0 : vector<1x8xf32>, vector<1x8xf32> -> vector<2x8xf32>
    %cst_50 = arith.constant dense<0.000000e+00> : vector<2xf32>
    %238 = vector.multi_reduction <add>, %237, %cst_50 [1] : vector<2x8xf32> to vector<2xf32>
    %239 = vector.shape_cast %238 : vector<2xf32> to vector<2x1xf32>
    %240 = vector.extract_strided_slice %239 {offsets = [0, 0], sizes = [1, 1], strides = [1, 1]} : vector<2x1xf32> to vector<1x1xf32>
    %241 = vector.extract_strided_slice %239 {offsets = [1, 0], sizes = [1, 1], strides = [1, 1]} : vector<2x1xf32> to vector<1x1xf32>
    %242 = tpu.reciprocal %241 : vector<1x1xf32> -> vector<1x1xf32>
    %243 = arith.mulf %240, %242 : vector<1x1xf32>
    %244 = arith.index_cast %c4_i32 : i32 to index
    %c0_51 = arith.constant 0 : index
    %245 = vector.load %arg4[%244, %c0_51] : memref<6x1xf32, #tpu.memory_space<vmem>>, vector<1x1xf32>
    tpu.vector_store %arg4[%244, %c0_51], %243 {strides = array<i32>} : memref<6x1xf32, #tpu.memory_space<vmem>>, vector<1x1xf32>,
    %c5_i32 = arith.constant 5 : i32
    %246 = arith.index_cast %c5_i32 : i32 to index
    %c0_52 = arith.constant 0 : index
    %247 = vector.load %arg0[%246, %c0_52] : memref<6x8xf32, #tpu.memory_space<vmem>>, vector<1x8xf32>
    %c1_i32_53 = arith.constant 1 : i32
    %248 = arith.addi %200, %c1_i32_53 : i32
    %249 = arith.sitofp %248 : i32 to f32
    %cst_54 = arith.constant 1.000000e+00 : f32
    %250 = arith.divf %cst_54, %249 : f32
    %cst_55 = arith.constant 1.000000e+00 : f32
    %251 = arith.subf %cst_55, %250 : f32
    %252 = arith.mulf %251, %205 : f32
    %253 = arith.addf %252, %250 : f32
    %cst_56 = arith.constant 1.000000e+00 : f32
    %254 = arith.divf %cst_56, %253 : f32
    %255 = vector.broadcast %251 : f32 to vector<1x8xf32>
    %256 = arith.mulf %255, %213 : vector<1x8xf32>
    %257 = vector.broadcast %250 : f32 to vector<1x8xf32>
    %258 = arith.mulf %257, %247 : vector<1x8xf32>
    %259 = arith.addf %256, %258 : vector<1x8xf32>
    %260 = vector.broadcast %254 : f32 to vector<1x8xf32>
    %261 = arith.mulf %259, %260 : vector<1x8xf32>
    %cst_57 = arith.constant 9.99999997E-7 : f32
    %262 = vector.broadcast %cst_57 : f32 to vector<1x8xf32>
    %263 = arith.addf %247, %262 : vector<1x8xf32>
    %cst_58 = arith.constant 9.99999997E-7 : f32
    %264 = vector.broadcast %cst_58 : f32 to vector<1x8xf32>
    %265 = arith.addf %261, %264 : vector<1x8xf32>
    %266 = arith.divf %263, %265 : vector<1x8xf32>
    %267 = vector.broadcast %251 : f32 to vector<1x8xf32>
    %268 = arith.mulf %267, %225 : vector<1x8xf32>
    %269 = vector.broadcast %250 : f32 to vector<1x8xf32>
    %270 = arith.mulf %269, %266 : vector<1x8xf32>
    %271 = arith.addf %268, %270 : vector<1x8xf32>
    %272 = vector.broadcast %254 : f32 to vector<1x8xf32>
    %273 = arith.mulf %271, %272 : vector<1x8xf32>
    %274 = arith.subf %266, %225 : vector<1x8xf32>
    %275 = arith.subf %266, %273 : vector<1x8xf32>
    %276 = arith.mulf %274, %275 : vector<1x8xf32>
    %277 = arith.addf %229, %276 : vector<1x8xf32>
    %278 = vector.broadcast %250 : f32 to vector<1x8xf32>
    %279 = arith.mulf %277, %278 : vector<1x8xf32>
    %cst_59 = arith.constant 9.99999997E-7 : f32
    %280 = vector.broadcast %cst_59 : f32 to vector<1x8xf32>
    %281 = arith.addf %279, %280 : vector<1x8xf32>
    %282 = math.sqrt %281 : vector<1x8xf32>
    %283 = arith.divf %282, %273 : vector<1x8xf32>
    %284 = arith.mulf %283, %247 : vector<1x8xf32>
    %285 = tpu.concatenate %284, %283 in 0 : vector<1x8xf32>, vector<1x8xf32> -> vector<2x8xf32>
    %cst_60 = arith.constant dense<0.000000e+00> : vector<2xf32>
    %286 = vector.multi_reduction <add>, %285, %cst_60 [1] : vector<2x8xf32> to vector<2xf32>
    %287 = vector.shape_cast %286 : vector<2xf32> to vector<2x1xf32>
    %288 = vector.extract_strided_slice %287 {offsets = [0, 0], sizes = [1, 1], strides = [1, 1]} : vector<2x1xf32> to vector<1x1xf32>
    %289 = vector.extract_strided_slice %287 {offsets = [1, 0], sizes = [1, 1], strides = [1, 1]} : vector<2x1xf32> to vector<1x1xf32>
    %290 = tpu.reciprocal %289 : vector<1x1xf32> -> vector<1x1xf32>
    %291 = arith.mulf %288, %290 : vector<1x1xf32>
    %292 = arith.index_cast %c5_i32 : i32 to index
    %c0_61 = arith.constant 0 : index
    %293 = vector.load %arg4[%292, %c0_61] : memref<6x1xf32, #tpu.memory_space<vmem>>, vector<1x1xf32>
    tpu.vector_store %arg4[%292, %c0_61], %291 {strides = array<i32>} : memref<6x1xf32, #tpu.memory_space<vmem>>, vector<1x1xf32>,
    %c6_i32 = arith.constant 6 : i32
    %294 = tpu.concatenate %261, %273, %277 in 0 : vector<1x8xf32>, vector<1x8xf32>, vector<1x8xf32> -> vector<3x8xf32>
    %c0_62 = arith.constant 0 : index
    %c0_63 = arith.constant 0 : index
    %295 = vector.load %arg5[%c0_62, %c0_63] : memref<3x8xf32, #tpu.memory_space<vmem>>, vector<3x8xf32>
    tpu.vector_store %arg5[%c0_62, %c0_63], %294 {strides = array<i32>} : memref<3x8xf32, #tpu.memory_space<vmem>>, vector<3x8xf32>,
    %c0_64 = arith.constant 0 : index
    %296 = memref.load %arg6[%c0_64] : memref<1xi32, #tpu.memory_space<smem>>
    memref.store %248, %arg6[%c0_64] : memref<1xi32, #tpu.memory_space<smem>>
    %c0_65 = arith.constant 0 : index
    %297 = memref.load %arg7[%c0_65] : memref<1xf32, #tpu.memory_space<smem>>
    memref.store %253, %arg7[%c0_65] : memref<1xf32, #tpu.memory_space<smem>>
    return
  }
}

</mosaic_0001>

<bundles_post_ra>
// kernel: cov_balancer_forward_batched.1
= control target key start
LH: loop header
LB: loop body
LE: loop exit
PB: predicated region body
PF: predicated region fallthrough
CT: control target
= control target key end

     0   :  { %15 = vsyncpa [#allocation5], 0  ;;  %s829_s0 = inlined_call_operand.vmem [shape: f32[6,8], index: 0, kind: input, shape index: {}]   ;;  %s830_s1 = inlined_call_operand.vmem [shape: f32[3,8], index: 1, kind: input, shape index: {}, may-alias: {1,5}]   ;;  %s831_s2 = inlined_call_operand.<no memory space> [shape: s32[1], index: 2, kind: input, shape index: {}, may-alias: {2,6}]   ;;  %s832_s3 = inlined_call_operand.<no memory space> [shape: f32[1], index: 3, kind: input, shape index: {}, may-alias: {3,7}]   ;;  %s833_s4 = inlined_call_operand.vmem [shape: f32[6,1], index: 4, kind: output, shape index: {0}]   ;;  %s834_s5 = inlined_call_operand.vmem [shape: f32[3,8], index: 5, kind: output, shape index: {1}, may-alias: {1,5}]   ;;  %s835_s6 = inlined_call_operand.hbm [shape: s32[1], index: 6, kind: output, shape index: {2}, may-alias: {2,6}]   ;;  %s836_s7 = inlined_call_operand.hbm [shape: f32[1], index: 7, kind: output, shape index: {3}, may-alias: {3,7}]  }
   0x1   :  { %s29_s26 = sadd.s32 1, %s831_s2 }
   0x2   :  { %s30_s27 = scvt.s32.f32 %s29_s26 }
   0x3   :  { %16 = vsyncpa [#allocation7], 0  ;;  %s107_s30 = sadd.s32 2, %s831_s2  ;;  %v25_v7 = vld [vmem:[%s830_s1] sm:$0x7]  ;;  %s180_s20 = sadd.s32 3, %s831_s2 }
   0x4   :  { %v31_v0 = vstv %s30_s27  ;;  %s108_s9 = scvt.s32.f32 %s107_s30  ;;  %v28_v9 = vld [vmem:[%s829_s0] sm:$0x1]  ;;  %s181_s23 = scvt.s32.f32 %s180_s20  ;;  %v58_v29 = vrot.slane %v25_v7, 1  ;;  %vm93_vm2 = vcmask 1040384   ;;  %vm95_vm3 = vcmask 58368  }
   0x5   :  { %539 = vrcp.f32 %v31_v0  ;;  %v47_v20 = vadd.f32 1e-06, %v28_v9  ;;  %v84_v44 = vrot.slane %v28_v9, 6  ;;  %v106_v52 = vld [vmem:[%s829_s0 + $0x1] sm:$0x1]  ;;  %s253_s30 = sadd.s32 4, %s831_s2 }
   0x6   :  { %v109_v2 = vstv %s108_s9  ;;  %v182_v17 = vstv %s181_s23  ;;  %v125_v0 = vadd.f32 1e-06, %v106_v52  ;;  %s399_s16 = sadd.s32 6, %s831_s2  ;;  %vm104_vm8 = vcmask 0  }
   0x7   :  { %541 = vrcp.f32 %v109_v2  ;;  %477 = sst [smem:[#allocation4]] %s399_s16  ;;  %vm472_vm13 = vcmask 1041408   ;;  %vm474_vm14 = vcmask 59392  }
  0x12   :  { %v540_v1 = vpop.eup %539 }
  0x13   :  { %513 = vpush %v540_v1 }
  0x14   :  { %v542_v4 = vpop.eup %541 }
  0x44   :  { %s514_s8 = spop %513 }
  0x45   :  { %s34_s10 = ssub.f32 1.0, %s514_s8  ;;  %v42_v8 = vstv %s514_s8 }
  0x46   :  { %v43_v11 = vmul.f32 %v42_v8, %v28_v9 }
  0x47   :  { %s35_s13 = smul.f32 %s34_s10, %s832_s3  ;;  %v40_v6 = vstv %s34_s10  ;;  %s254_s10 = scvt.s32.f32 %s253_s30 }
  0x48   :  { %v41_v10 = vmul.f32 %v40_v6, %v25_v7 }
  0x49   :  { %s36_s14 = sadd.f32 %s514_s8, %s35_s13  ;;  %v255_v61 = vstv %s254_s10  ;;  %s632_s10 = smov [#allocation6]  }
  0x4a   :  { %v44_v12 = vadd.f32 %v43_v11, %v41_v10 }
  0x4b   :  { %v37_v3 = vstv %s36_s14 }
  0x4c   :  { %543 = vrcp.f32 %v37_v3 }
  0x59   :  { %v544_v5 = vpop.eup %543 }
  0x5a   :  { %515 = vpush %v544_v5 }
  0x5b   :  { %517 = vpush %v542_v4 }
  0x8b   :  { %s516_s21 = spop %515 }
  0x8c   :  { %v45_v13 = vstv %s516_s21  ;;  %s691_s22 = spop %517 }
  0x8d   :  { %v46_v14 = vmul.f32 %v45_v13, %v44_v12  ;;  %s112_s1 = ssub.f32 1.0, %s691_s22  ;;  %v120_v51 = vstv %s691_s22 }
  0x8e   :  { %v121_v55 = vmul.f32 %v120_v51, %v106_v52 }
  0x8f   :  { %v48_v15 = vadd.f32 1e-06, %v46_v14  ;;  %s113_s24 = smul.f32 %s112_s1, %s36_s14  ;;  %v118_v16 = vstv %s112_s1 }
  0x90   :  { %v119_v18 = vmul.f32 %v118_v16, %v46_v14 }
  0x91   :  { %545 = vrcp.f32 %v48_v15  ;;  %s695_s25 = sadd.f32 %s691_s22, %s113_s24  ;;  %s326_s22 = sadd.s32 5, %s831_s2 }
  0x92   :  { %547 = vrcp.f32 %v182_v17  ;;  %v122_v56 = vadd.f32 %v121_v55, %v119_v18  ;;  %s327_s24 = scvt.s32.f32 %s326_s22 }
  0x93   :  { %v115_v19 = vstv %s695_s25 }
  0x94   :  { %549 = vrcp.f32 %v115_v19 }
  0x9e   :  { %v546_v21 = vpop.eup %545 }
  0x9f   :  { %v50_v22 = vmul.f32 %v546_v21, %v47_v20  ;;  %v548_v23 = vpop.eup %547 }
  0xa1   :  { %v550_v24 = vpop.eup %549  ;;  %v51_v25 = vmul.f32 %v50_v22, %v42_v8  ;;  %v60_v32 = vsub.f32 %v50_v22, %v58_v29 }
  0xa2   :  { %519 = vpush %v550_v24 }
  0xa3   :  { %v53_v26 = vrot.slane %v51_v25, 7  ;;  %521 = vpush %v548_v23  ;;  %v160_v23 = vrot.slane %v106_v52, 6 }
  0xa5   :  { %v55_v27 = vadd.f32 %v53_v26, %v41_v10 }
  0xa7   :  { %v56_v28 = vmul.f32 %v55_v27, %v45_v13 }
  0xa9   :  { %v62_v30 = vrot.slane %v56_v28, 1  ;;  %v129_v31 = vmul.f32 %v118_v16, %v56_v28  ;;  %v79_v39 = vrot.slane %v56_v28, 7 }
  0xab   :  { %v64_v33 = vsub.f32 %v50_v22, %v62_v30 }
  0xad   :  { %v65_v34 = vmul.f32 %v64_v33, %v60_v32 }
  0xaf   :  { %v67_v35 = vrot.slane %v65_v34, 6 }
  0xb1   :  { %v698_v36 = vadd.f32 %v67_v35, %v25_v7 }
  0xb3   :  { %v70_v37 = vmul.f32 %v698_v36, %v42_v8 }
  0xb5   :  { %v71_v38 = vadd.f32 1e-06, %v70_v37 }
  0xb7   :  { %551 = vrsqrt.f32 %v71_v38  ;;  %vm74_vm0 = vcmp.eq.f32.partialorder %v71_v38, inf  ;;  %v77_v42 = vand.u32 2147483648, %v71_v38  ;;  %vm76_vm1 = vcmp.eq.f32.partialorder %v71_v38, 0.0 }
  0xb8   :  { %553 = vrcp.f32 %v79_v39 }
  0xc4   :  { %v552_v40 = vpop.eup %551 }
  0xc5   :  { %v73_v41 = vmul.f32 %v552_v40, %v71_v38  ;;  %v554_v45 = vpop.eup %553  ;;  %v328_v40 = vstv %s327_s24 }
  0xc7   :  { %v75_v43 = vsel %vm74_vm0, %v71_v38, %v73_v41 }
  0xc8   :  { %v78_v46 = vsel %vm76_vm1, %v77_v42, %v75_v43 }
  0xc9   :  { %v82_v47 = vmul.f32 %v554_v45, %v78_v46 }
  0xcb   :  { %v86_v48 = vmul.f32 %v84_v44, %v82_v47  ;;  %v91_v50 = vrot.slane %v82_v47, 1 }
  0xcd   :  { %v88_v49 = vrot.slane %v86_v48, 2 }
  0xcf   :  { %v94_v53 = vsel %vm93_vm2, %v88_v49, %v91_v50 }
  0xd0   :  { %v96_v54 = vsel %vm95_vm3, %v94_v53, 0.0 }
  0xd1   :  { %97 = vadd.xlane.f32.xlu0 %v96_v54 }
  0xd3   :  { %s520_s8 = spop %519 }
  0xd4   :  { %v123_v57 = vstv %s520_s8  ;;  %s710_s9 = spop %521 }
  0xd5   :  { %v124_v58 = vmul.f32 %v123_v57, %v122_v56  ;;  %s185_s11 = ssub.f32 1.0, %s710_s9 }
  0xd7   :  { %v126_v59 = vadd.f32 1e-06, %v124_v58  ;;  %s186_s12 = smul.f32 %s185_s11, %s695_s25  ;;  %v191_v60 = vstv %s185_s11  ;;  %s400_s11 = scvt.s32.f32 %s399_s16 }
  0xd8   :  { %v192_v62 = vmul.f32 %v191_v60, %v124_v58 }
  0xd9   :  { %555 = vrcp.f32 %v126_v59  ;;  %s715_s13 = sadd.f32 %s710_s9, %s186_s12 }
  0xda   :  { %557 = vrcp.f32 %v255_v61 }
  0xdb   :  { %v188_v63 = vstv %s715_s13 }
  0xdc   :  { %559 = vrcp.f32 %v188_v63 }
  0xe6   :  { %v556_v1 = vpop.eup %555 }
  0xe7   :  { %v128_v2 = vmul.f32 %v556_v1, %v125_v0  ;;  %v558_v3 = vpop.eup %557 }
  0xe9   :  { %v560_v4 = vpop.eup %559  ;;  %v130_v5 = vmul.f32 %v128_v2, %v120_v51  ;;  %v136_v6 = vsub.f32 %v128_v2, %v62_v30  ;;  %v193_v30 = vstv %s710_s9 }
  0xea   :  { %523 = vpush %v560_v4 }
  0xeb   :  { %v132_v7 = vrot.slane %v130_v5, 7  ;;  %525 = vpush %v558_v3 }
  0xed   :  { %v134_v8 = vadd.f32 %v132_v7, %v129_v31  ;;  %v179_v31 = vld [vmem:[%s829_s0 + $0x2] sm:$0x1] }
  0xee   :  { %v194_v34 = vmul.f32 %v193_v30, %v179_v31  ;;  %v198_v43 = vadd.f32 1e-06, %v179_v31 }
  0xef   :  { %v135_v9 = vmul.f32 %v134_v8, %v123_v57 }
  0xf0   :  { %v195_v35 = vadd.f32 %v194_v34, %v192_v62 }
  0xf1   :  { %v138_v10 = vrot.slane %v135_v9, 1  ;;  %v202_v11 = vmul.f32 %v191_v60, %v135_v9  ;;  %v155_v18 = vrot.slane %v135_v9, 7 }
  0xf3   :  { %v140_v12 = vsub.f32 %v128_v2, %v138_v10  ;;  %v233_v2 = vrot.slane %v179_v31, 6 }
  0xf5   :  { %v141_v13 = vmul.f32 %v140_v12, %v136_v6 }
  0xf7   :  { %v143_v14 = vrot.slane %v141_v13, 6 }
  0xf9   :  { %v145_v15 = vadd.f32 %v143_v14, %v698_v36 }
  0xfb   :  { %v146_v16 = vmul.f32 %v145_v15, %v120_v51 }
  0xfd   :  { %v147_v17 = vadd.f32 1e-06, %v146_v16 }
  0xff   :  { %561 = vrsqrt.f32 %v147_v17  ;;  %vm150_vm4 = vcmp.eq.f32.partialorder %v147_v17, inf  ;;  %v153_v21 = vand.u32 2147483648, %v147_v17  ;;  %vm152_vm5 = vcmp.eq.f32.partialorder %v147_v17, 0.0 }
 0x100   :  { %563 = vrcp.f32 %v155_v18 }
 0x10c   :  { %v562_v19 = vpop.eup %561 }
 0x10d   :  { %v149_v20 = vmul.f32 %v562_v19, %v147_v17  ;;  %v564_v24 = vpop.eup %563 }
 0x10f   :  { %v151_v22 = vsel %vm150_vm4, %v147_v17, %v149_v20 }
 0x110   :  { %v154_v25 = vsel %vm152_vm5, %v153_v21, %v151_v22  ;;  %v401_v21 = vstv %s400_s11 }
 0x111   :  { %v158_v26 = vmul.f32 %v564_v24, %v154_v25 }
 0x113   :  { %v162_v27 = vmul.f32 %v160_v23, %v158_v26  ;;  %v167_v29 = vrot.slane %v158_v26, 1 }
 0x115   :  { %v164_v28 = vrot.slane %v162_v27, 2 }
 0x117   :  { %v169_v32 = vsel %vm93_vm2, %v164_v28, %v167_v29 }
 0x118   :  { %v170_v33 = vsel %vm95_vm3, %v169_v32, 0.0 }
 0x119   :  { %171 = vadd.xlane.f32.xlu0 %v170_v33 }
 0x11b   :  { %s524_s23 = spop %523 }
 0x11c   :  { %v196_v36 = vstv %s524_s23  ;;  %s735_s1 = spop %525 }
 0x11d   :  { %v197_v37 = vmul.f32 %v196_v36, %v195_v35  ;;  %s258_s25 = ssub.f32 1.0, %s735_s1 }
 0x11f   :  { %v199_v38 = vadd.f32 1e-06, %v197_v37  ;;  %s259_s26 = smul.f32 %s258_s25, %s715_s13  ;;  %v264_v39 = vstv %s258_s25 }
 0x120   :  { %v265_v41 = vmul.f32 %v264_v39, %v197_v37 }
 0x121   :  { %565 = vrcp.f32 %v199_v38  ;;  %s740_s27 = sadd.f32 %s735_s1, %s259_s26 }
 0x122   :  { %567 = vrcp.f32 %v328_v40 }
 0x123   :  { %v261_v42 = vstv %s740_s27 }
 0x124   :  { %569 = vrcp.f32 %v261_v42 }
 0x12e   :  { %v566_v44 = vpop.eup %565 }
 0x12f   :  { %v201_v45 = vmul.f32 %v566_v44, %v198_v43  ;;  %v568_v46 = vpop.eup %567 }
 0x131   :  { %v570_v47 = vpop.eup %569  ;;  %v203_v48 = vmul.f32 %v201_v45, %v193_v30  ;;  %v209_v49 = vsub.f32 %v201_v45, %v138_v10  ;;  %v266_v10 = vstv %s735_s1 }
 0x132   :  { %527 = vpush %v570_v47 }
 0x133   :  { %v205_v50 = vrot.slane %v203_v48, 7  ;;  %529 = vpush %v568_v46 }
 0x135   :  { %v207_v51 = vadd.f32 %v205_v50, %v202_v11  ;;  %v752_v11 = vld [vmem:[%s829_s0 + $0x3] sm:$0x1] }
 0x136   :  { %v267_v14 = vmul.f32 %v266_v10, %v752_v11  ;;  %v271_v26 = vadd.f32 1e-06, %v752_v11 }
 0x137   :  { %v208_v52 = vmul.f32 %v207_v51, %v196_v36 }
 0x139   :  { %v211_v53 = vrot.slane %v208_v52, 1  ;;  %v743_v54 = vmul.f32 %v264_v39, %v208_v52  ;;  %v228_v61 = vrot.slane %v208_v52, 7 }
 0x13b   :  { %v213_v55 = vsub.f32 %v201_v45, %v211_v53 }
 0x13d   :  { %v214_v56 = vmul.f32 %v213_v55, %v209_v49  ;;  %v306_v49 = vrot.slane %v752_v11, 6 }
 0x13f   :  { %v216_v57 = vrot.slane %v214_v56, 6 }
 0x141   :  { %v745_v58 = vadd.f32 %v216_v57, %v145_v15  ;;  %v268_v15 = vadd.f32 %v267_v14, %v265_v41 }
 0x143   :  { %v219_v59 = vmul.f32 %v745_v58, %v193_v30 }
 0x145   :  { %v220_v60 = vadd.f32 1e-06, %v219_v59 }
 0x147   :  { %571 = vrsqrt.f32 %v220_v60  ;;  %vm223_vm6 = vcmp.eq.f32.partialorder %v220_v60, inf  ;;  %v226_v0 = vand.u32 2147483648, %v220_v60  ;;  %vm225_vm7 = vcmp.eq.f32.partialorder %v220_v60, 0.0 }
 0x148   :  { %573 = vrcp.f32 %v228_v61 }
 0x154   :  { %v572_v62 = vpop.eup %571 }
 0x155   :  { %v222_v63 = vmul.f32 %v572_v62, %v220_v60  ;;  %v574_v3 = vpop.eup %573 }
 0x157   :  { %v224_v1 = vsel %vm223_vm6, %v220_v60, %v222_v63 }
 0x158   :  { %v227_v4 = vsel %vm225_vm7, %v226_v0, %v224_v1 }
 0x159   :  { %v231_v5 = vmul.f32 %v574_v3, %v227_v4 }
 0x15a   :  { %v98_v6 = vpop.xlane.xlu0 %97 }
 0x15b   :  { %575 = vrcp.f32 %v98_v6  ;;  %v235_v7 = vmul.f32 %v233_v2, %v231_v5  ;;  %v240_v9 = vrot.slane %v231_v5, 1 }
 0x15d   :  { %v237_v8 = vrot.slane %v235_v7, 2 }
 0x15f   :  { %v242_v12 = vsel %vm93_vm2, %v237_v8, %v240_v9 }
 0x160   :  { %v243_v13 = vsel %vm95_vm3, %v242_v12, 0.0 }
 0x161   :  { %244 = vadd.xlane.f32.xlu1 %v243_v13 }
 0x163   :  { %s757_s30 = spop %527 }
 0x164   :  { %v269_v16 = vstv %s757_s30  ;;  %s760_s8 = spop %529  ;;  %s631_s30 = smov [#allocation4]  }
 0x165   :  { %v270_v17 = vmul.f32 %v269_v16, %v268_v15  ;;  %s331_s12 = ssub.f32 1.0, %s760_s8  ;;  %v339_v57 = vstv %s760_s8 }
 0x166   :  { %491 = dma.smem_to_hbm %s631_s30, 16, %s835_s6, [#allocation5]  }
 0x167   :  { %v272_v18 = vadd.f32 1e-06, %v270_v17  ;;  %s332_s13 = smul.f32 %s331_s12, %s740_s27  ;;  %v337_v19 = vstv %s331_s12 }
 0x168   :  { %v576_v20 = vpop.eup %575  ;;  %v338_v22 = vmul.f32 %v337_v19, %v270_v17 }
 0x169   :  { %v101_v23 = vrot.slane %v576_v20, 1  ;;  %577 = vrcp.f32 %v272_v18  ;;  %s769_s14 = sadd.f32 %s760_s8, %s332_s13 }
 0x16a   :  { %579 = vrcp.f32 %v401_v21 }
 0x16b   :  { %v103_v24 = vmul.f32 %v101_v23, %v98_v6  ;;  %v334_v25 = vstv %s769_s14 }
 0x16c   :  { %581 = vrcp.f32 %v334_v25 }
 0x16d   :  { %105 = vst.msk [vmem:[%s833_s4] sm:$0x1] %vm104_vm8, %v103_v24 }
 0x176   :  { %v578_v27 = vpop.eup %577 }
 0x177   :  { %v274_v28 = vmul.f32 %v578_v27, %v271_v26  ;;  %v580_v29 = vpop.eup %579 }
 0x179   :  { %v582_v30 = vpop.eup %581  ;;  %v276_v31 = vmul.f32 %v274_v28, %v266_v10  ;;  %v282_v32 = vsub.f32 %v274_v28, %v211_v53 }
 0x17a   :  { %531 = vpush %v582_v30 }
 0x17b   :  { %v278_v33 = vrot.slane %v276_v31, 7  ;;  %533 = vpush %v580_v29 }
 0x17d   :  { %v280_v34 = vadd.f32 %v278_v33, %v743_v54 }
 0x17f   :  { %v281_v35 = vmul.f32 %v280_v34, %v269_v16 }
 0x181   :  { %v284_v36 = vrot.slane %v281_v35, 1  ;;  %v348_v37 = vmul.f32 %v337_v19, %v281_v35  ;;  %v301_v44 = vrot.slane %v281_v35, 7 }
 0x183   :  { %v286_v38 = vsub.f32 %v274_v28, %v284_v36 }
 0x185   :  { %v287_v39 = vmul.f32 %v286_v38, %v282_v32 }
 0x187   :  { %v289_v40 = vrot.slane %v287_v39, 6  ;;  %v398_v39 = vld [vmem:[%s829_s0 + $0x5] sm:$0x1] }
 0x189   :  { %v291_v41 = vadd.f32 %v289_v40, %v745_v58  ;;  %v325_v58 = vld [vmem:[%s829_s0 + $0x4] sm:$0x1] }
 0x18a   :  { %v340_v61 = vmul.f32 %v339_v57, %v325_v58  ;;  %v344_v8 = vadd.f32 1e-06, %v325_v58  ;;  %v379_v30 = vrot.slane %v325_v58, 6 }
 0x18b   :  { %v292_v42 = vmul.f32 %v291_v41, %v266_v10 }
 0x18c   :  { %v341_v62 = vadd.f32 %v340_v61, %v338_v22 }
 0x18d   :  { %v293_v43 = vadd.f32 1e-06, %v292_v42 }
 0x18f   :  { %583 = vrsqrt.f32 %v293_v43  ;;  %vm296_vm9 = vcmp.eq.f32.partialorder %v293_v43, inf  ;;  %v299_v47 = vand.u32 2147483648, %v293_v43  ;;  %vm298_vm10 = vcmp.eq.f32.partialorder %v293_v43, 0.0 }
 0x190   :  { %585 = vrcp.f32 %v301_v44 }
 0x19c   :  { %v584_v45 = vpop.eup %583 }
 0x19d   :  { %v295_v46 = vmul.f32 %v584_v45, %v293_v43  ;;  %v586_v50 = vpop.eup %585 }
 0x19f   :  { %v297_v48 = vsel %vm296_vm9, %v293_v43, %v295_v46 }
 0x1a0   :  { %v300_v51 = vsel %vm298_vm10, %v299_v47, %v297_v48 }
 0x1a1   :  { %v304_v52 = vmul.f32 %v586_v50, %v300_v51  ;;  %v417_v50 = vadd.f32 1e-06, %v398_v39 }
 0x1a2   :  { %v172_v53 = vpop.xlane.xlu0 %171 }
 0x1a3   :  { %587 = vrcp.f32 %v172_v53  ;;  %v308_v54 = vmul.f32 %v306_v49, %v304_v52  ;;  %v313_v56 = vrot.slane %v304_v52, 1 }
 0x1a5   :  { %v310_v55 = vrot.slane %v308_v54, 2 }
 0x1a7   :  { %v315_v59 = vsel %vm93_vm2, %v310_v55, %v313_v56 }
 0x1a8   :  { %v316_v60 = vsel %vm95_vm3, %v315_v59, 0.0 }
 0x1a9   :  { %317 = vadd.xlane.f32.xlu1 %v316_v60 }
 0x1ab   :  { %s532_s18 = spop %531 }
 0x1ac   :  { %v342_v63 = vstv %s532_s18  ;;  %s786_s3 = spop %533 }
 0x1ad   :  { %v343_v0 = vmul.f32 %v342_v63, %v341_v62  ;;  %s404_s19 = ssub.f32 1.0, %s786_s3  ;;  %v412_v38 = vstv %s786_s3 }
 0x1ae   :  { %v413_v42 = vmul.f32 %v412_v38, %v398_v39 }
 0x1af   :  { %v345_v1 = vadd.f32 1e-06, %v343_v0  ;;  %s405_s20 = smul.f32 %s404_s19, %s769_s14  ;;  %v410_v2 = vstv %s404_s19 }
 0x1b0   :  { %v588_v3 = vpop.eup %587  ;;  %v411_v4 = vmul.f32 %v410_v2, %v343_v0 }
 0x1b1   :  { %v175_v5 = vrot.slane %v588_v3, 1  ;;  %589 = vrcp.f32 %v345_v1  ;;  %s406_s21 = sadd.f32 %s786_s3, %s405_s20 }
 0x1b2   :  { %v414_v43 = vadd.f32 %v413_v42, %v411_v4 }
 0x1b3   :  { %v177_v6 = vmul.f32 %v175_v5, %v172_v53  ;;  %v407_v7 = vstv %s406_s21  ;;  %479 = sst [smem:[#allocation6]] %s406_s21 }
 0x1b4   :  { %591 = vrcp.f32 %v407_v7  ;;  %499 = dma.smem_to_hbm %s632_s10, 16, %s836_s7, [#allocation7]  }
 0x1b5   :  { %178 = vst.msk [vmem:[%s833_s4 + $0x1] sm:$0x1] %vm104_vm8, %v177_v6 }
 0x1be   :  { %v590_v9 = vpop.eup %589 }
 0x1bf   :  { %v347_v10 = vmul.f32 %v590_v9, %v344_v8  ;;  %v452_v8 = vrot.slane %v398_v39, 6 }
 0x1c1   :  { %v592_v11 = vpop.eup %591  ;;  %v349_v12 = vmul.f32 %v347_v10, %v339_v57  ;;  %v355_v13 = vsub.f32 %v347_v10, %v284_v36 }
 0x1c2   :  { %535 = vpush %v592_v11 }
 0x1c3   :  { %v351_v14 = vrot.slane %v349_v12, 7 }
 0x1c5   :  { %v353_v15 = vadd.f32 %v351_v14, %v348_v37 }
 0x1c7   :  { %v354_v16 = vmul.f32 %v353_v15, %v342_v63 }
 0x1c9   :  { %v357_v17 = vrot.slane %v354_v16, 1  ;;  %v421_v18 = vmul.f32 %v410_v2, %v354_v16  ;;  %v374_v25 = vrot.slane %v354_v16, 7 }
 0x1cb   :  { %v359_v19 = vsub.f32 %v347_v10, %v357_v17 }
 0x1cd   :  { %v360_v20 = vmul.f32 %v359_v19, %v355_v13 }
 0x1cf   :  { %v362_v21 = vrot.slane %v360_v20, 6 }
 0x1d1   :  { %v364_v22 = vadd.f32 %v362_v21, %v291_v41 }
 0x1d3   :  { %v365_v23 = vmul.f32 %v364_v22, %v339_v57 }
 0x1d5   :  { %v366_v24 = vadd.f32 1e-06, %v365_v23 }
 0x1d7   :  { %593 = vrsqrt.f32 %v366_v24  ;;  %vm369_vm11 = vcmp.eq.f32.partialorder %v366_v24, inf  ;;  %v372_v28 = vand.u32 2147483648, %v366_v24  ;;  %vm371_vm12 = vcmp.eq.f32.partialorder %v366_v24, 0.0 }
 0x1d8   :  { %595 = vrcp.f32 %v374_v25 }
 0x1e4   :  { %v594_v26 = vpop.eup %593 }
 0x1e5   :  { %v368_v27 = vmul.f32 %v594_v26, %v366_v24  ;;  %v596_v31 = vpop.eup %595 }
 0x1e7   :  { %v370_v29 = vsel %vm369_vm11, %v366_v24, %v368_v27 }
 0x1e8   :  { %v373_v32 = vsel %vm371_vm12, %v372_v28, %v370_v29 }
 0x1e9   :  { %v377_v33 = vmul.f32 %v596_v31, %v373_v32 }
 0x1ea   :  { %v245_v34 = vpop.xlane.xlu1 %244 }
 0x1eb   :  { %597 = vrcp.f32 %v245_v34  ;;  %v381_v35 = vmul.f32 %v379_v30, %v377_v33  ;;  %v386_v37 = vrot.slane %v377_v33, 1 }
 0x1ed   :  { %v383_v36 = vrot.slane %v381_v35, 2 }
 0x1ef   :  { %v388_v40 = vsel %vm93_vm2, %v383_v36, %v386_v37 }
 0x1f0   :  { %v389_v41 = vsel %vm95_vm3, %v388_v40, 0.0 }
 0x1f1   :  { %390 = vadd.xlane.f32.xlu0 %v389_v41 }
 0x1f3   :  { %s536_s25 = spop %535 }
 0x1f4   :  { %v415_v44 = vstv %s536_s25 }
 0x1f5   :  { %v416_v45 = vmul.f32 %v415_v44, %v414_v43 }
 0x1f7   :  { %v418_v46 = vadd.f32 1e-06, %v416_v45 }
 0x1f8   :  { %v598_v47 = vpop.eup %597 }
 0x1f9   :  { %v248_v48 = vrot.slane %v598_v47, 1  ;;  %599 = vrcp.f32 %v418_v46 }
 0x1fb   :  { %v250_v49 = vmul.f32 %v248_v48, %v245_v34 }
 0x1fd   :  { %251 = vst.msk [vmem:[%s833_s4 + $0x2] sm:$0x1] %vm104_vm8, %v250_v49 }
 0x206   :  { %v600_v51 = vpop.eup %599 }
 0x207   :  { %v420_v52 = vmul.f32 %v600_v51, %v417_v50 }
 0x209   :  { %v422_v53 = vmul.f32 %v420_v52, %v412_v38  ;;  %v428_v54 = vsub.f32 %v420_v52, %v357_v17 }
 0x20b   :  { %v424_v55 = vrot.slane %v422_v53, 7 }
 0x20d   :  { %v426_v56 = vadd.f32 %v424_v55, %v421_v18 }
 0x20f   :  { %v427_v57 = vmul.f32 %v426_v56, %v415_v44 }
 0x211   :  { %v430_v58 = vrot.slane %v427_v57, 1  ;;  %v471_v59 = vsel %vm93_vm2, %v416_v45, %v427_v57  ;;  %v447_v3 = vrot.slane %v427_v57, 7 }
 0x213   :  { %v432_v60 = vsub.f32 %v420_v52, %v430_v58 }
 0x215   :  { %v433_v61 = vmul.f32 %v432_v60, %v428_v54 }
 0x217   :  { %v435_v62 = vrot.slane %v433_v61, 6 }
 0x219   :  { %v437_v63 = vadd.f32 %v435_v62, %v364_v22 }
 0x21b   :  { %v438_v0 = vmul.f32 %v437_v63, %v412_v38  ;;  %v473_v1 = vsel %vm472_vm13, %v471_v59, %v437_v63 }
 0x21c   :  { %475 = vst.msk [vmem:[%s834_s5] sm:$0x7] %vm474_vm14, %v473_v1 }
 0x21d   :  { %v439_v2 = vadd.f32 1e-06, %v438_v0 }
 0x21f   :  { %601 = vrsqrt.f32 %v439_v2  ;;  %vm442_vm15 = vcmp.eq.f32.partialorder %v439_v2, inf  ;;  %v445_v6 = vand.u32 2147483648, %v439_v2  ;;  %vm444_vm0 = vcmp.eq.f32.partialorder %v439_v2, 0.0 }
 0x220   :  { %603 = vrcp.f32 %v447_v3 }
 0x22c   :  { %v602_v4 = vpop.eup %601 }
 0x22d   :  { %v441_v5 = vmul.f32 %v602_v4, %v439_v2  ;;  %v604_v9 = vpop.eup %603 }
 0x22f   :  { %v443_v7 = vsel %vm442_vm15, %v439_v2, %v441_v5 }
 0x230   :  { %v446_v10 = vsel %vm444_vm0, %v445_v6, %v443_v7 }
 0x231   :  { %v450_v11 = vmul.f32 %v604_v9, %v446_v10 }
 0x232   :  { %v318_v12 = vpop.xlane.xlu1 %317 }
 0x233   :  { %605 = vrcp.f32 %v318_v12  ;;  %v454_v13 = vmul.f32 %v452_v8, %v450_v11  ;;  %v459_v15 = vrot.slane %v450_v11, 1 }
 0x235   :  { %v456_v14 = vrot.slane %v454_v13, 2 }
 0x237   :  { %v461_v16 = vsel %vm93_vm2, %v456_v14, %v459_v15 }
 0x238   :  { %v462_v17 = vsel %vm95_vm3, %v461_v16, 0.0 }
 0x239   :  { %463 = vadd.xlane.f32.xlu1 %v462_v17 }
 0x240   :  { %v606_v18 = vpop.eup %605 }
 0x241   :  { %v321_v19 = vrot.slane %v606_v18, 1 }
 0x243   :  { %v323_v20 = vmul.f32 %v321_v19, %v318_v12 }
 0x245   :  { %324 = vst.msk [vmem:[%s833_s4 + $0x3] sm:$0x1] %vm104_vm8, %v323_v20 }
 0x27a   :  { %v391_v21 = vpop.xlane.xlu0 %390 }
 0x27b   :  { %607 = vrcp.f32 %v391_v21 }
 0x288   :  { %v608_v22 = vpop.eup %607 }
 0x289   :  { %v394_v23 = vrot.slane %v608_v22, 1 }
 0x28b   :  { %v396_v24 = vmul.f32 %v394_v23, %v391_v21 }
 0x28d   :  { %397 = vst.msk [vmem:[%s833_s4 + $0x4] sm:$0x1] %vm104_vm8, %v396_v24 }
 0x2c2   :  { %v464_v25 = vpop.xlane.xlu1 %463 }
 0x2c3   :  { %609 = vrcp.f32 %v464_v25 }
 0x2d0   :  { %v610_v26 = vpop.eup %609 }
 0x2d1   :  { %v467_v27 = vrot.slane %v610_v26, 1 }
 0x2d3   :  { %v469_v28 = vmul.f32 %v467_v27, %v464_v25 }
 0x2d5   :  { %470 = vst.msk [vmem:[%s833_s4 + $0x5] sm:$0x1] %vm104_vm8, %v469_v28 }
 0x2d6   :  { %627 = dma.done.wait [#allocation5], 16  }
 0x2d7   :  { %628 = vsyncadd [#allocation5], 4294967280 }
 0x2d8   :  { %629 = dma.done.wait [#allocation7], 16  }
 0x2d9   :  { %630 = vsyncadd [#allocation7], 4294967280 }
 0x2da   :  { %510 = sfence }
 0x2db   :  { %511 = vsyncpa [#allocation5], 1 }
 0x2dc   :  { %512 = vsyncpa [#allocation7], 1 }

</bundles_post_ra>
